<compile_context>
chip_gen: v5e
topology: v5e:2x2
jax: 0.10.0
libtpu: 0.0.40
codegen_flags: <defaults>
</compile_context>

<pallas_src>
import functools

import jax
import jax.numpy as jnp
from jax.experimental import pallas as pl
from jax.experimental.pallas import tpu as pltpu

OUT_DIM = 2      # logits produced by the module
LANE = 128       # lane-padded width used only for the in-kernel layer-3 MXU matmul


def _discriminator_kernel(y_ref, w1_ref, b1_ref, w2_ref, b2_ref, w3_ref, b3_ref, o_ref):
    """Fused 3-layer MLP with Swish activations on one (TB, y_dim) batch tile."""
    mxu_dt = w1_ref.dtype  # bf16 weights -> bf16 MXU operands; f32 weights -> f32 path.

    # Layer 1: Linear(y_dim, y_dim) + Swish   (f32 accumulation, f32 activation math)
    h = jnp.dot(y_ref[...].astype(mxu_dt), w1_ref[...],
                preferred_element_type=jnp.float32) + b1_ref[...]
    h = h * jax.nn.sigmoid(h)                 # Swish; sigmoid -> EUP slot

    # Layer 2: Linear(y_dim, y_dim) + Swish
    h = jnp.dot(h.astype(mxu_dt), w2_ref[...],
                preferred_element_type=jnp.float32) + b2_ref[...]
    h = h * jax.nn.sigmoid(h)

    # Layer 3: Linear(y_dim, LANE) on the MXU (zero-padded head), but only the first
    # OUT_DIM lanes are real -> slice before the store so HBM writeback is (tb, 2) only.
    o = jnp.dot(h.astype(mxu_dt), w3_ref[...],
                preferred_element_type=jnp.float32) + b3_ref[...]
    o_ref[...] = o[:, :OUT_DIM].astype(o_ref.dtype)


def _pick_batch_tile(B, y_dim, block_b=None):
    """Balanced batch tile: minimal padding, >=2 grid steps when possible, big at small y_dim."""
    if block_b is not None:
        return max(8, ((int(block_b) + 7) // 8) * 8)
    cap = 2048 if y_dim <= 256 else 512          # large tiles amortize ~0.35us/step overhead
    half = ((-(-B // 2)) + 7) // 8 * 8           # cap so n_tiles >= 2 (both v7x TCs active)
    cap = max(8, min(cap, half))
    n_tiles = -(-B // cap)
    return ((-(-B // n_tiles)) + 7) // 8 * 8     # balanced -> <8 rows of batch padding


@functools.partial(jax.jit, static_argnames=("block_b",))
def discriminator_forward(y, params, block_b=None):
    """y: (B, y_dim). Returns squeeze(net(y)) like the PyTorch module (shape (B, 2) for B>1)."""
    w1, b1, w2, b2, w3, b3 = params
    B, y_dim = y.shape

    # Lane-padded layer-3 head for the MXU only: (y_dim, 2) -> (y_dim, 128); bias likewise.
    w3p = jnp.zeros((y_dim, LANE), w3.dtype).at[:, :OUT_DIM].set(w3)
    b3p = jnp.zeros((1, LANE), b3.dtype).at[:, :OUT_DIM].set(b3)

    tb = _pick_batch_tile(B, y_dim, block_b)
    n_tiles = pl.cdiv(B, tb)
    b_padded = n_tiles * tb
    yp = y if b_padded == B else jnp.pad(y, ((0, b_padded - B), (0, 0)))

    # Explicit VMEM budget: resident weights (assume double-buffered, conservative) plus
    # double-buffered streamed input/output tiles, 2x headroom, clamped to v7x's 64 MiB.
    ws = jnp.dtype(w1.dtype).itemsize
    xs = jnp.dtype(y.dtype).itemsize
    weight_bytes = (2 * y_dim * y_dim + y_dim * LANE) * ws + (2 * y_dim + LANE) * 4
    stream_bytes = 2 * tb * y_dim * xs + 2 * tb * OUT_DIM * 4
    vmem_limit = int(min(64 << 20, max(16 << 20, 2 * (2 * weight_bytes + stream_bytes))))

    const = lambda i: (0, 0)  # weights/biases: same block every grid step -> stay resident
    out = pl.pallas_call(
        _discriminator_kernel,
        out_shape=jax.ShapeDtypeStruct((b_padded, OUT_DIM), jnp.float32),
        grid=(n_tiles,),
        in_specs=[
            pl.BlockSpec((tb, y_dim), lambda i: (i, 0)),   # streamed batch tile
            pl.BlockSpec((y_dim, y_dim), const),           # w1
            pl.BlockSpec((1, y_dim), const),               # b1 (f32)
            pl.BlockSpec((y_dim, y_dim), const),           # w2
            pl.BlockSpec((1, y_dim), const),               # b2 (f32)
            pl.BlockSpec((y_dim, LANE), const),            # w3 (lane-padded for MXU)
            pl.BlockSpec((1, LANE), const),                # b3 (lane-padded, f32)
        ],
        # Narrow (tb, 2) output block: last dim equals full array dim (legal); writeback
        # is one contiguous tb*8-byte chunk per step instead of the old tb*512-byte slab.
        out_specs=pl.BlockSpec((tb, OUT_DIM), lambda i: (i, 0)),
        compiler_params=pltpu.CompilerParams(
            dimension_semantics=("parallel",),             # shard batch tiles across TCs (v7x)
            vmem_limit_bytes=vmem_limit,
        ),
    )(yp, w1, b1, w2, b2, w3p, b3p)

    logits = out[:B]
    # PyTorch .squeeze(): drop all size-1 dims (no-op for B > 1).
    return jnp.squeeze(logits)


def init_params(key, y_dim):
    """nn.Linear-style init U(-1/sqrt(fan_in), 1/sqrt(fan_in)).
    Weights stored as (in_features, out_features); biases as (1, out)."""
    ks = jax.random.split(key, 6)

    def linear(kw, kb, fan_in, fan_out):
        bound = 1.0 / jnp.sqrt(jnp.float32(fan_in))
        w = jax.random.uniform(kw, (fan_in, fan_out), jnp.float32, -bound, bound)
        b = jax.random.uniform(kb, (1, fan_out), jnp.float32, -bound, bound)
        return w, b

    w1, b1 = linear(ks[0], ks[1], y_dim, y_dim)
    w2, b2 = linear(ks[2], ks[3], y_dim, y_dim)
    w3, b3 = linear(ks[4], ks[5], y_dim, OUT_DIM)
    return (w1, b1, w2, b2, w3, b3)


def cast_weights(params, dtype):
    """Cast weight matrices (not biases) to `dtype`, e.g. bf16 for the MXU fast path."""
    w1, b1, w2, b2, w3, b3 = params
    return (w1.astype(dtype), b1, w2.astype(dtype), b2, w3.astype(dtype), b3)


def _reference_forward(y, params):
    """Pure-JAX reference mirroring the kernel's dtype policy (exact module math for f32)."""
    w1, b1, w2, b2, w3, b3 = params
    dt = w1.dtype
    h = jnp.dot(y.astype(dt), w1, preferred_element_type=jnp.float32) + b1
    h = h * jax.nn.sigmoid(h)
    h = jnp.dot(h.astype(dt), w2, preferred_element_type=jnp.float32) + b2
    h = h * jax.nn.sigmoid(h)
    o = jnp.dot(h.astype(dt), w3, preferred_element_type=jnp.float32) + b3
    return jnp.squeeze(o)


if __name__ == "__main__":
    key = jax.random.PRNGKey(0)
    k_x, k_p = jax.random.split(key)

    # Small shape consistent with the module (batch=2, y_dim=32), f32 exact path.
    B, y_dim = 2, 32
    y = jax.random.normal(k_x, (B, y_dim), jnp.float32)
    params = init_params(k_p, y_dim)

    out = jax.block_until_ready(discriminator_forward(y, params))
    ref = _reference_forward(y, params)
    assert out.shape == (B, OUT_DIM), out.shape
    assert jnp.allclose(out, ref, atol=1e-5, rtol=1e-5), "f32 mismatch vs JAX reference"

    # Exercise an explicit batch tile (B not a multiple of it) + bf16 weights / f32 accumulation.
    B2 = 40
    y2 = jax.random.normal(k_x, (B2, y_dim), jnp.float32)
    params_bf16 = cast_weights(params, jnp.bfloat16)
    out2 = jax.block_until_ready(discriminator_forward(y2, params_bf16, block_b=16))
    ref2 = _reference_forward(y2, params_bf16)
    assert out2.shape == (B2, OUT_DIM), out2.shape
    assert jnp.allclose(out2, ref2, atol=1e-2, rtol=1e-2), "bf16 mismatch vs JAX reference"

    # Exercise the auto tile-balancing path (2 balanced grid steps, <8 rows padding), f32.
    B3 = 260
    y3 = jax.random.normal(k_x, (B3, y_dim), jnp.float32)
    out3 = jax.block_until_ready(discriminator_forward(y3, params))
    ref3 = _reference_forward(y3, params)
    assert out3.shape == (B3, OUT_DIM), out3.shape
    assert jnp.allclose(out3, ref3, atol=1e-5, rtol=1e-5), "f32 mismatch (auto-tiled path)"

    print("KERNEL_OK")
</pallas_src>

<mosaic_0001>
module attributes {stable_mosaic.version = 11 : i64} {
  func.func @_discriminator_kernel(%arg0: i32, %arg1: memref<8x32xf32, #tpu.memory_space<vmem>>, %arg2: memref<32x32xf32, #tpu.memory_space<vmem>>, %arg3: memref<1x32xf32, #tpu.memory_space<vmem>>, %arg4: memref<32x32xf32, #tpu.memory_space<vmem>>, %arg5: memref<1x32xf32, #tpu.memory_space<vmem>>, %arg6: memref<32x128xf32, #tpu.memory_space<vmem>>, %arg7: memref<1x128xf32, #tpu.memory_space<vmem>>, %arg8: memref<8x2xf32, #tpu.memory_space<vmem>>) attributes {dimension_semantics = [#tpu.dimension_semantics<parallel>], iteration_bounds = array<i64: 1>, scalar_prefetch = 0 : i64, scratch_operands = 0 : i64, tpu.core_type = #tpu.core_type<tc>, window_params = [{transform_indices = @transform_0, window_bounds = array<i64: 8, 32>}, {pipeline_mode = #tpu.pipeline_mode<synchronous>, transform_indices = @transform_1, window_bounds = array<i64: 32, 32>}, {pipeline_mode = #tpu.pipeline_mode<synchronous>, transform_indices = @transform_2, window_bounds = array<i64: 1, 32>}, {pipeline_mode = #tpu.pipeline_mode<synchronous>, transform_indices = @transform_3, window_bounds = array<i64: 32, 32>}, {pipeline_mode = #tpu.pipeline_mode<synchronous>, transform_indices = @transform_4, window_bounds = array<i64: 1, 32>}, {pipeline_mode = #tpu.pipeline_mode<synchronous>, transform_indices = @transform_5, window_bounds = array<i64: 32, 128>}, {pipeline_mode = #tpu.pipeline_mode<synchronous>, transform_indices = @transform_6, window_bounds = array<i64: 1, 128>}, {transform_indices = @transform_7, window_bounds = array<i64: 8, 2>}]} {
    %c0 = arith.constant 0 : index
    %c0_0 = arith.constant 0 : index
    %0 = vector.load %arg1[%c0, %c0_0] : memref<8x32xf32, #tpu.memory_space<vmem>>, vector<8x32xf32>
    %c0_1 = arith.constant 0 : index
    %c0_2 = arith.constant 0 : index
    %1 = vector.load %arg2[%c0_1, %c0_2] : memref<32x32xf32, #tpu.memory_space<vmem>>, vector<32x32xf32>
    %cst = arith.constant dense<0.000000e+00> : vector<8x32xf32>
    %2 = tpu.matmul %0, %1, %cst {dimension_numbers = #tpu.dot_dimension_numbers<[1], [0], [0], [1], [0, 0, 1, 1], [], []>} : vector<8x32xf32>, vector<32x32xf32>, vector<8x32xf32> -> vector<8x32xf32>
    %c0_3 = arith.constant 0 : index
    %c0_4 = arith.constant 0 : index
    %3 = vector.load %arg3[%c0_3, %c0_4] : memref<1x32xf32, #tpu.memory_space<vmem>>, vector<1x32xf32>
    %4 = vector.broadcast %3 : vector<1x32xf32> to vector<8x32xf32>
    %5 = arith.addf %2, %4 : vector<8x32xf32>
    %6 = arith.negf %5 : vector<8x32xf32>
    %7 = math.exp %6 : vector<8x32xf32>
    %cst_5 = arith.constant 1.000000e+00 : f32
    %8 = vector.broadcast %cst_5 : f32 to vector<8x32xf32>
    %9 = arith.addf %8, %7 : vector<8x32xf32>
    %10 = arith.divf %8, %9 : vector<8x32xf32>
    %11 = arith.mulf %5, %10 : vector<8x32xf32>
    %c0_6 = arith.constant 0 : index
    %c0_7 = arith.constant 0 : index
    %12 = vector.load %arg4[%c0_6, %c0_7] : memref<32x32xf32, #tpu.memory_space<vmem>>, vector<32x32xf32>
    %cst_8 = arith.constant dense<0.000000e+00> : vector<8x32xf32>
    %13 = tpu.matmul %11, %12, %cst_8 {dimension_numbers = #tpu.dot_dimension_numbers<[1], [0], [0], [1], [0, 0, 1, 1], [], []>} : vector<8x32xf32>, vector<32x32xf32>, vector<8x32xf32> -> vector<8x32xf32>
    %c0_9 = arith.constant 0 : index
    %c0_10 = arith.constant 0 : index
    %14 = vector.load %arg5[%c0_9, %c0_10] : memref<1x32xf32, #tpu.memory_space<vmem>>, vector<1x32xf32>
    %15 = vector.broadcast %14 : vector<1x32xf32> to vector<8x32xf32>
    %16 = arith.addf %13, %15 : vector<8x32xf32>
    %17 = arith.negf %16 : vector<8x32xf32>
    %18 = math.exp %17 : vector<8x32xf32>
    %cst_11 = arith.constant 1.000000e+00 : f32
    %19 = vector.broadcast %cst_11 : f32 to vector<8x32xf32>
    %20 = arith.addf %19, %18 : vector<8x32xf32>
    %21 = arith.divf %19, %20 : vector<8x32xf32>
    %22 = arith.mulf %16, %21 : vector<8x32xf32>
    %c0_12 = arith.constant 0 : index
    %c0_13 = arith.constant 0 : index
    %23 = vector.load %arg6[%c0_12, %c0_13] : memref<32x128xf32, #tpu.memory_space<vmem>>, vector<32x128xf32>
    %cst_14 = arith.constant dense<0.000000e+00> : vector<8x128xf32>
    %24 = tpu.matmul %22, %23, %cst_14 {dimension_numbers = #tpu.dot_dimension_numbers<[1], [0], [0], [1], [0, 0, 1, 1], [], []>} : vector<8x32xf32>, vector<32x128xf32>, vector<8x128xf32> -> vector<8x128xf32>
    %c0_15 = arith.constant 0 : index
    %c0_16 = arith.constant 0 : index
    %25 = vector.load %arg7[%c0_15, %c0_16] : memref<1x128xf32, #tpu.memory_space<vmem>>, vector<1x128xf32>
    %26 = vector.broadcast %25 : vector<1x128xf32> to vector<8x128xf32>
    %27 = arith.addf %24, %26 : vector<8x128xf32>
    %28 = vector.extract_strided_slice %27 {offsets = [0, 0], sizes = [8, 2], strides = [1, 1]} : vector<8x128xf32> to vector<8x2xf32>
    %c0_17 = arith.constant 0 : index
    %c0_18 = arith.constant 0 : index
    %29 = vector.load %arg8[%c0_17, %c0_18] : memref<8x2xf32, #tpu.memory_space<vmem>>, vector<8x2xf32>
    tpu.vector_store %arg8[%c0_17, %c0_18], %28 {strides = array<i32>} : memref<8x2xf32, #tpu.memory_space<vmem>>, vector<8x2xf32>,
    return
  }
  func.func @transform_0(%arg0: i32) -> (i32, i32) {
    %c0_i32 = arith.constant 0 : i32
    %c0_i32_0 = arith.constant 0 : i32
    return %arg0, %c0_i32 : i32, i32
  }
  func.func @transform_1(%arg0: i32) -> (i32, i32) {
    %c0_i32 = arith.constant 0 : i32
    %c0_i32_0 = arith.constant 0 : i32
    %c0_i32_1 = arith.constant 0 : i32
    return %c0_i32, %c0_i32_0 : i32, i32
  }
  func.func @transform_2(%arg0: i32) -> (i32, i32) {
    %c0_i32 = arith.constant 0 : i32
    %c0_i32_0 = arith.constant 0 : i32
    %c0_i32_1 = arith.constant 0 : i32
    return %c0_i32, %c0_i32_0 : i32, i32
  }
  func.func @transform_3(%arg0: i32) -> (i32, i32) {
    %c0_i32 = arith.constant 0 : i32
    %c0_i32_0 = arith.constant 0 : i32
    %c0_i32_1 = arith.constant 0 : i32
    return %c0_i32, %c0_i32_0 : i32, i32
  }
  func.func @transform_4(%arg0: i32) -> (i32, i32) {
    %c0_i32 = arith.constant 0 : i32
    %c0_i32_0 = arith.constant 0 : i32
    %c0_i32_1 = arith.constant 0 : i32
    return %c0_i32, %c0_i32_0 : i32, i32
  }
  func.func @transform_5(%arg0: i32) -> (i32, i32) {
    %c0_i32 = arith.constant 0 : i32
    %c0_i32_0 = arith.constant 0 : i32
    %c0_i32_1 = arith.constant 0 : i32
    return %c0_i32, %c0_i32_0 : i32, i32
  }
  func.func @transform_6(%arg0: i32) -> (i32, i32) {
    %c0_i32 = arith.constant 0 : i32
    %c0_i32_0 = arith.constant 0 : i32
    %c0_i32_1 = arith.constant 0 : i32
    return %c0_i32, %c0_i32_0 : i32, i32
  }
  func.func @transform_7(%arg0: i32) -> (i32, i32) {
    %c0_i32 = arith.constant 0 : i32
    %c0_i32_0 = arith.constant 0 : i32
    return %arg0, %c0_i32 : i32, i32
  }
}

</mosaic_0001>

<bundles_post_ra>
// kernel: discriminator_forward.1
= control target key start
LH: loop header
LB: loop body
LE: loop exit
PB: predicated region body
PF: predicated region fallthrough
CT: control target
= control target key end

     0   :  { %vm35_vm0 = vcmask 261120   ;;  %vm161_vm9 = vcmask 15360   ;;  %s277_s1 = inlined_call_operand.vmem [shape: f32[32,32], index: 1, kind: input, shape index: {}]   ;;  %s278_s2 = inlined_call_operand.vmem [shape: f32[1,32], index: 2, kind: input, shape index: {}]   ;;  %s279_s0 = inlined_call_operand.vmem [shape: f32[8,32], index: 0, kind: input, shape index: {}]   ;;  %s280_s4 = inlined_call_operand.vmem [shape: f32[1,32], index: 4, kind: input, shape index: {}]   ;;  %s281_s3 = inlined_call_operand.vmem [shape: f32[32,32], index: 3, kind: input, shape index: {}]   ;;  %s282_s6 = inlined_call_operand.vmem [shape: f32[1,128], index: 6, kind: input, shape index: {}]   ;;  %s283_s5 = inlined_call_operand.vmem [shape: f32[32,128], index: 5, kind: input, shape index: {}]   ;;  %s284_s7 = inlined_call_operand.vmem [shape: f32[8,2], index: 7, kind: output, shape index: {}]  }
   0x1   :  { %v30_v0 = vld [vmem:[%s277_s1 + $0x18] sm:$0xff]  ;;  %v29_v1 = vld [vmem:[%s277_s1 + $0x10] sm:$0xff]  ;;  %v28_v2 = vld [vmem:[%s277_s1 + $0x8] sm:$0xff] }
   0x2   :  { %51 = vmatpush.msra.mxu0 %v30_v0  ;;  %v27_v3 = vld [vmem:[%s277_s1] sm:$0xff]  ;;  %v82_v5 = vld [vmem:[%s281_s3 + $0x18] sm:$0xff]  ;;  %v81_v6 = vld [vmem:[%s281_s3 + $0x10] sm:$0xff] }
   0x3   :  { %v26_v4 = vld [vmem:[%s279_s0] sm:$0xff]  ;;  %102 = vmatpush.msra.mxu1 %v82_v5  ;;  %v80_v8 = vld [vmem:[%s281_s3 + $0x8] sm:$0xff]  ;;  %v133_v26 = vld [vmem:[%s283_s5 + $0x18] sm:$0xff] }
   0x4   :  { %52 = vmatpush.msra.mxu0 %v29_v1  ;;  %v172_v7 = vld [vmem:[%s278_s2] ss:$0 sm:$0xff]  ;;  %153 = vmatpush.msra.mxu2 %v133_v26  ;;  %v132_v27 = vld [vmem:[%s283_s5 + $0x10] sm:$0xff]  ;;  %v131_v29 = vld [vmem:[%s283_s5 + $0x8] sm:$0xff] }
   0x5   :  { %103 = vmatpush.msra.mxu1 %v81_v6  ;;  %v79_v9 = vld [vmem:[%s281_s3] sm:$0xff] }
   0x6   :  { %53 = vmatpush.msra.mxu0 %v28_v2  ;;  %154 = vmatpush.msra.mxu2 %v132_v27  ;;  %v173_v28 = vld [vmem:[%s280_s4] ss:$0 sm:$0xff] }
   0x7   :  { %104 = vmatpush.msra.mxu1 %v80_v8  ;;  %v130_v30 = vld [vmem:[%s283_s5] sm:$0xff] }
   0x8   :  { %54 = vmatpush.msra.mxu0 %v27_v3  ;;  %155 = vmatpush.msra.mxu2 %v131_v29  ;;  %v174_v47 = vld [vmem:[%s282_s6] ss:$0 sm:$0xff] }
   0x9   :  { %167 = vmatmul.msk.f32.vlgmr.msra.gmra.mxu0 %vm35_vm0, %v26_v4  ;;  %105 = vmatpush.msra.mxu1 %v79_v9 }
   0xa   :  { %156 = vmatpush.msra.mxu2 %v130_v30 }
  0x86   :  { %v56_v10 = vpop.f32.mrf.mxu0 }
  0x87   :  { %v57_v11 = vadd.f32 %v172_v7, %v56_v10 }
  0x89   :  { %v168_v12 = vmul.f32 -1.442695, %v57_v11 }
  0x8b   :  { %175 = vpow2.f32 %v168_v12 }
  0x91   :  { %v176_v13 = vpop.eup %175 }
  0x92   :  { %v62_v14 = vadd.f32 1.0, %v176_v13 }
  0x94   :  { %177 = vrcp.f32 %v62_v14  ;;  %v74_v18 = vand.u32 2147483648, %v62_v14  ;;  %v72_v20 = vand.u32 2147483647, %v62_v14  ;;  %vm68_vm2 = vweird.f32 %v62_v14 }
  0x96   :  { %v75_v22 = vor.u32 1.1754944e-38, %v74_v18  ;;  %vm73_vm4 = vcmp.eq.f32.partialorder %v72_v20, 8.507059e+37 }
  0x9a   :  { %v178_v15 = vpop.eup %177 }
  0x9b   :  { %v64_v16 = vmul.f32 %v178_v15, %v62_v14  ;;  %vm69_vm1 = vweird.f32 %v178_v15 }
  0x9c   :  { %vm70_vm3 = vmor %vm68_vm2, %vm69_vm1 }
  0x9d   :  { %v65_v17 = vsub.f32 1.0, %v64_v16 }
  0x9f   :  { %v66_v19 = vmul.f32 %v178_v15, %v65_v17 }
  0xa1   :  { %v67_v21 = vadd.f32 %v178_v15, %v66_v19 }
  0xa3   :  { %v71_v23 = vsel %vm70_vm3, %v178_v15, %v67_v21 }
  0xa4   :  { %v76_v24 = vsel %vm73_vm4, %v75_v22, %v71_v23 }
  0xa5   :  { %v78_v25 = vmul.f32 %v76_v24, %v57_v11 }
  0xa7   :  { %169 = vmatmul.msk.f32.vlgmr.msra.gmra.mxu1 %vm35_vm0, %v78_v25 }
 0x124   :  { %v107_v31 = vpop.f32.mrf.mxu1 }
 0x125   :  { %v108_v32 = vadd.f32 %v173_v28, %v107_v31 }
 0x127   :  { %v170_v33 = vmul.f32 -1.442695, %v108_v32 }
 0x129   :  { %179 = vpow2.f32 %v170_v33 }
 0x12f   :  { %v180_v34 = vpop.eup %179 }
 0x130   :  { %v113_v35 = vadd.f32 1.0, %v180_v34 }
 0x132   :  { %181 = vrcp.f32 %v113_v35  ;;  %v125_v39 = vand.u32 2147483648, %v113_v35  ;;  %v123_v41 = vand.u32 2147483647, %v113_v35  ;;  %vm119_vm6 = vweird.f32 %v113_v35 }
 0x134   :  { %v126_v43 = vor.u32 1.1754944e-38, %v125_v39  ;;  %vm124_vm8 = vcmp.eq.f32.partialorder %v123_v41, 8.507059e+37 }
 0x138   :  { %v182_v36 = vpop.eup %181 }
 0x139   :  { %v115_v37 = vmul.f32 %v182_v36, %v113_v35  ;;  %vm120_vm5 = vweird.f32 %v182_v36 }
 0x13a   :  { %vm121_vm7 = vmor %vm119_vm6, %vm120_vm5 }
 0x13b   :  { %v116_v38 = vsub.f32 1.0, %v115_v37 }
 0x13d   :  { %v117_v40 = vmul.f32 %v182_v36, %v116_v38 }
 0x13f   :  { %v118_v42 = vadd.f32 %v182_v36, %v117_v40 }
 0x141   :  { %v122_v44 = vsel %vm121_vm7, %v182_v36, %v118_v42 }
 0x142   :  { %v127_v45 = vsel %vm124_vm8, %v126_v43, %v122_v44 }
 0x143   :  { %v129_v46 = vmul.f32 %v127_v45, %v108_v32 }
 0x145   :  { %171 = vmatmul.msk.f32.vlgmr.msra.gmra.mxu2 %vm35_vm0, %v129_v46 }
 0x1c8   :  { %v158_v48 = vpop.f32.mrf.mxu2 }
 0x1c9   :  { %v159_v49 = vadd.f32 %v174_v47, %v158_v48 }
 0x1cb   :  { %162 = vst.msk [vmem:[%s284_s7] sm:$0xff] %vm161_vm9, %v159_v49 }

</bundles_post_ra>
